<compile_context>
chip_gen: v7x
topology: tpu7x:2x2x1
jax: 0.10.0
libtpu: 0.0.40
codegen_flags: <defaults>
</compile_context>

<pallas_src>
import functools
import math

import jax
import jax.numpy as jnp
from jax.experimental import pallas as pl
from jax.experimental.pallas import tpu as pltpu

_LANE = 128
_SUBLANE = 8


def _round_up(v, m):
    return ((v + m - 1) // m) * m


def _cdiv(a, b):
    return -(-a // b)


def _device_kind():
    try:
        return jax.devices()[0].device_kind.lower()
    except Exception:
        return ""


def _physical_vmem_bytes():
    try:
        return int(pltpu.get_tpu_info().vmem_capacity_bytes)
    except Exception:
        return 64 * 1024 * 1024  # conservative lower bound (v7x per-TensorCore)


def _epilogue_dtype_for_device():
    # bf16 EUP/VPU exists on v6e/v7x; v5e and older keep the epilogue in f32.
    kind = _device_kind()
    if any(tag in kind for tag in ("v6", "v7", "tpu7")):
        return jnp.bfloat16
    return jnp.float32


def _default_tile_n():
    # v5e reaches its compute roofline around ~256 rows; v6e/v7x benefit from
    # larger batch tiles per weight pass.
    return 256 if "v5" in _device_kind() else 512


def _pick_divisor_tile(total, target, quantum=_LANE):
    """Largest multiple of `quantum` dividing `total`, <= max(target, quantum)."""
    units = total // quantum
    cap = max(target // quantum, 1)
    best = 1
    for d in range(1, units + 1):
        if units % d == 0 and d <= cap:
            best = d
    return best * quantum


def _pad2(a, rows, cols):
    pr = rows - a.shape[0]
    pc = cols - a.shape[1]
    if pr == 0 and pc == 0:
        return a
    return jnp.pad(a, ((0, pr), (0, pc)))


def _sigmoid(z):
    # sigmoid(z) == 0.5*(tanh(0.5*z)+1): exact identity, a single EUP tanh,
    # no full-precision divide (weak-typed literals keep the input dtype).
    return 0.5 * (jnp.tanh(0.5 * z) + 1.0)


def lstm_cell_kernel(x_ref, h_ref, c_ref, wx_ref, wh_ref, b_ref,
                     h_out_ref, c_out_ref, *, epilogue_dtype):
    """One (batch-tile, hidden-tile) block of an LSTM cell.

    x_ref  : (tile_n, In_pad)      input, matmul dtype
    h_ref  : (tile_n, H_pad)       previous hidden, matmul dtype
    c_ref  : (tile_n, tile_h)      previous cell-state slice, f32
    wx_ref : (4, In_pad, tile_h)   per-gate W_ih^T slices, matmul dtype
    wh_ref : (4, H_pad, tile_h)    per-gate W_hh^T slices, matmul dtype
    b_ref  : (4, 1, tile_h)        folded bias (b_ih + b_hh), f32
    h_out  : (tile_n, tile_h)      caller dtype
    c_out  : (tile_n, tile_h)      f32 (HBM buffer aliased with c input)
    """
    x = x_ref[...]
    h = h_ref[...]

    def gate(k):
        g = jnp.dot(x, wx_ref[k], preferred_element_type=jnp.float32)
        g = g + jnp.dot(h, wh_ref[k], preferred_element_type=jnp.float32)
        return (g + b_ref[k]).astype(epilogue_dtype)

    i_gate = _sigmoid(gate(0))
    f_gate = _sigmoid(gate(1))
    g_gate = jnp.tanh(gate(2))
    o_gate = _sigmoid(gate(3))

    # Carried cell state stays f32 regardless of the epilogue dtype.
    c_new = (f_gate.astype(jnp.float32) * c_ref[...]
             + (i_gate * g_gate).astype(jnp.float32))
    h_new = o_gate * jnp.tanh(c_new.astype(epilogue_dtype))

    h_out_ref[...] = h_new.astype(h_out_ref.dtype)
    c_out_ref[...] = c_new


def prepare_lstm_params(weight_ih, weight_hh, bias_ih=None, bias_hh=None,
                        *, matmul_dtype=jnp.bfloat16):
    """One-time parameter preparation (hoisted out of the per-step path).

    Returns
      wx : (4, In_pad, H_pad)  per-gate W_ih^T, zero-padded, matmul dtype
      wh : (4, H_pad,  H_pad)  per-gate W_hh^T, zero-padded, matmul dtype
      b  : (4, 1,      H_pad)  bias_ih + bias_hh, zero-padded, f32

    Use matmul_dtype=jnp.float32 for strict f32 parity with torch.nn.LSTMCell.
    """
    four_h, input_size = weight_ih.shape
    hidden_size = four_h // 4
    in_pad = _round_up(input_size, _LANE)
    h_pad = _round_up(hidden_size, _LANE)

    def _prep_w(w, k, k_pad):
        w = w.astype(jnp.float32).reshape(4, hidden_size, k)
        w = jnp.pad(w, ((0, 0), (0, h_pad - hidden_size), (0, k_pad - k)))
        # (4, H_pad, K_pad) -> (4, K_pad, H_pad): per-gate W^T for x @ W^T.
        return jnp.transpose(w, (0, 2, 1)).astype(matmul_dtype)

    wx = _prep_w(weight_ih, input_size, in_pad)
    wh = _prep_w(weight_hh, hidden_size, h_pad)

    b = jnp.zeros((4 * hidden_size,), jnp.float32)
    if bias_ih is not None:
        b = b + bias_ih.astype(jnp.float32)
    if bias_hh is not None:
        b = b + bias_hh.astype(jnp.float32)
    b = b.reshape(4, 1, hidden_size)
    b = jnp.pad(b, ((0, 0), (0, 0), (0, h_pad - hidden_size)))
    return wx, wh, b


def lstm_cell(x, state, wx, wh, b, *, input_size, hidden_size,
              tile_n=None, tile_h=512):
    """Pallas LSTMCell forward; mirrors torch.nn.LSTMCell semantics.

    x     : (N, input_size) or (input_size,)
    state : None or (h_prev, c_prev), batched like x
    wx/wh/b: outputs of prepare_lstm_params
    Returns (h, c) batched like x, in x's dtype.
    """
    matmul_dtype = wx.dtype
    in_pad, h_pad = wx.shape[1], wx.shape[2]

    is_batched = x.ndim == 2
    if not is_batched:
        x = x[None, :]
    n = x.shape[0]
    if state is None:
        h_prev = jnp.zeros((n, hidden_size), x.dtype)
        c_prev = jnp.zeros((n, hidden_size), x.dtype)
    else:
        h_prev, c_prev = state
        if not is_batched:
            h_prev = h_prev[None, :]
            c_prev = c_prev[None, :]

    # --- tiling --------------------------------------------------------------
    if tile_n is None:
        tile_n = _default_tile_n()
    # Balanced batch tiles: never leave a last tile that is ~all padding.
    num_n = _cdiv(n, tile_n)
    tile_n_eff = _round_up(_cdiv(n, num_n), _SUBLANE)
    n_pad = num_n * tile_n_eff
    # Hidden-axis tiles: lane-aligned divisor of H_pad. Bounds the per-step
    # weight block (v7x 64 MiB VMEM) and gives megacore a second parallel axis.
    tile_h_eff = _pick_divisor_tile(h_pad, tile_h)
    num_h = h_pad // tile_h_eff

    # --- operand padding / casts (no [x|h] concat: one less HBM round trip) --
    x_p = _pad2(x.astype(matmul_dtype), n_pad, in_pad)
    h_p = _pad2(h_prev.astype(matmul_dtype), n_pad, h_pad)
    c_p = _pad2(c_prev.astype(jnp.float32), n_pad, h_pad)

    # --- VMEM budget, clamped to the chip's physical VMEM ---------------------
    mm = jnp.dtype(matmul_dtype).itemsize
    out_b = jnp.dtype(x.dtype).itemsize
    block_bytes = (
        tile_n_eff * in_pad * mm                     # x tile
        + tile_n_eff * h_pad * mm                    # h_prev tile
        + tile_n_eff * tile_h_eff * 4                # c_prev slice
        + 4 * in_pad * tile_h_eff * mm               # wx block
        + 4 * h_pad * tile_h_eff * mm                # wh block
        + 4 * tile_h_eff * 4                         # bias block
        + tile_n_eff * tile_h_eff * (out_b + 4))     # h_out + c_out
    scratch_bytes = 10 * tile_n_eff * tile_h_eff * 4  # gates + epilogue temps
    budget = 2 * block_bytes + scratch_bytes + (4 << 20)   # 2x = double-buffering
    phys = _physical_vmem_bytes()
    vmem_limit = int(max(16 << 20, min(budget, phys - (2 << 20))))

    # bf16 epilogue only when the matmul path is already bf16 (v6e/v7x);
    # strict f32 parameter path keeps the whole kernel in f32.
    if jnp.dtype(matmul_dtype) == jnp.dtype(jnp.float32):
        epilogue_dtype = jnp.float32
    else:
        epilogue_dtype = _epilogue_dtype_for_device()

    kernel = functools.partial(lstm_cell_kernel, epilogue_dtype=epilogue_dtype)

    # TODO(synk): for sequence workloads, move the timestep loop inside one
    # pallas_call (T as an "arbitrary" grid axis, h/c carried in VMEM scratch)
    # so the weights are DMA'd from HBM once per sequence rather than per step.

    h_out, c_out = pl.pallas_call(
        kernel,
        out_shape=(
            jax.ShapeDtypeStruct((n_pad, h_pad), x.dtype),       # h (caller dtype)
            jax.ShapeDtypeStruct((n_pad, h_pad), jnp.float32),   # c (f32, aliased)
        ),
        grid=(num_n, num_h),
        in_specs=[
            pl.BlockSpec((tile_n_eff, in_pad), lambda i, j: (i, 0)),        # x
            pl.BlockSpec((tile_n_eff, h_pad), lambda i, j: (i, 0)),         # h_prev
            pl.BlockSpec((tile_n_eff, tile_h_eff), lambda i, j: (i, j)),    # c_prev
            pl.BlockSpec((4, in_pad, tile_h_eff), lambda i, j: (0, 0, j)),  # wx
            pl.BlockSpec((4, h_pad, tile_h_eff), lambda i, j: (0, 0, j)),   # wh
            pl.BlockSpec((4, 1, tile_h_eff), lambda i, j: (0, 0, j)),       # bias
        ],
        out_specs=(
            pl.BlockSpec((tile_n_eff, tile_h_eff), lambda i, j: (i, j)),
            pl.BlockSpec((tile_n_eff, tile_h_eff), lambda i, j: (i, j)),
        ),
        input_output_aliases={2: 1},   # padded f32 c_prev buffer -> c_out
        compiler_params=pltpu.CompilerParams(
            dimension_semantics=("parallel", "parallel"),
            vmem_limit_bytes=vmem_limit,
        ),
    )(x_p, h_p, c_p, wx, wh, b)

    h = h_out[:n, :hidden_size]                    # already in x.dtype
    c = c_out[:n, :hidden_size].astype(x.dtype)    # no-op when x is f32
    if not is_batched:
        h = h[0]
        c = c[0]
    return h, c


if __name__ == "__main__":
    # Small shapes consistent with the module: batch=8, input_size=16, hidden=32.
    N, input_size, hidden_size = 8, 16, 32
    key = jax.random.PRNGKey(0)
    kx, kh, kc, k1, k2, k3, k4 = jax.random.split(key, 7)

    bound = math.sqrt(1.0 / hidden_size)
    weight_ih = jax.random.uniform(k1, (4 * hidden_size, input_size),
                                   jnp.float32, -bound, bound)
    weight_hh = jax.random.uniform(k2, (4 * hidden_size, hidden_size),
                                   jnp.float32, -bound, bound)
    bias_ih = jax.random.uniform(k3, (4 * hidden_size,), jnp.float32, -bound, bound)
    bias_hh = jax.random.uniform(k4, (4 * hidden_size,), jnp.float32, -bound, bound)

    x = jax.random.normal(kx, (N, input_size), jnp.float32)
    h_prev = jax.random.normal(kh, (N, hidden_size), jnp.float32)
    c_prev = jax.random.normal(kc, (N, hidden_size), jnp.float32)

    # One-time parameter prep (gate-major stack / pad / bf16 cast).
    wx, wh, b = prepare_lstm_params(weight_ih, weight_hh, bias_ih, bias_hh)

    fwd = jax.jit(functools.partial(lstm_cell,
                                    input_size=input_size,
                                    hidden_size=hidden_size))
    h_out, c_out = fwd(x, (h_prev, c_prev), wx, wh, b)
    jax.block_until_ready((h_out, c_out))

    # Unbatched path (module also accepts (input_size,) inputs).
    h1, c1 = fwd(x[0], (h_prev[0], c_prev[0]), wx, wh, b)
    jax.block_until_ready((h1, c1))

    # References: one with matched matmul numerics (bf16 operands, f32 acc),
    # one in pure f32 matching the PyTorch module semantics.
    def reference(xv, hv, cv, cast_dtype):
        xm = xv.astype(cast_dtype).astype(jnp.float32)
        hm = hv.astype(cast_dtype).astype(jnp.float32)
        wih = weight_ih.astype(cast_dtype).astype(jnp.float32)
        whh = weight_hh.astype(cast_dtype).astype(jnp.float32)
        gates = xm @ wih.T + hm @ whh.T + bias_ih + bias_hh
        H = hidden_size
        i = jax.nn.sigmoid(gates[:, 0 * H:1 * H])
        f = jax.nn.sigmoid(gates[:, 1 * H:2 * H])
        g = jnp.tanh(gates[:, 2 * H:3 * H])
        o = jax.nn.sigmoid(gates[:, 3 * H:4 * H])
        c_new = f * cv + i * g
        return o * jnp.tanh(c_new), c_new

    h_m, c_m = reference(x, h_prev, c_prev, jnp.bfloat16)   # kernel matmul numerics
    h_f, c_f = reference(x, h_prev, c_prev, jnp.float32)    # PyTorch f32 semantics

    # Tight tolerance depends on whether the epilogue ran in bf16 (v6e/v7x) or f32.
    tight = 1e-4 if _epilogue_dtype_for_device() == jnp.float32 else 2e-2

    assert h_out.shape == (N, hidden_size) and c_out.shape == (N, hidden_size)
    assert h1.shape == (hidden_size,) and c1.shape == (hidden_size,)
    assert jnp.allclose(h_out, h_m, atol=tight, rtol=tight)
    assert jnp.allclose(c_out, c_m, atol=tight, rtol=tight)
    assert jnp.allclose(h_out, h_f, atol=3e-2, rtol=3e-2)
    assert jnp.allclose(c_out, c_f, atol=3e-2, rtol=3e-2)
    assert jnp.allclose(h1, h_m[0], atol=tight, rtol=tight)
    assert jnp.allclose(c1, c_m[0], atol=tight, rtol=tight)

    print("KERNEL_OK")
</pallas_src>

<mosaic_0001>
module attributes {stable_mosaic.version = 11 : i64} {
  func.func @lstm_cell_kernel(%arg0: i32, %arg1: i32, %arg2: memref<8x128xbf16, #tpu.memory_space<vmem>>, %arg3: memref<8x128xbf16, #tpu.memory_space<vmem>>, %arg4: memref<8x128xf32, #tpu.memory_space<vmem>>, %arg5: memref<4x128x128xbf16, #tpu.memory_space<vmem>>, %arg6: memref<4x128x128xbf16, #tpu.memory_space<vmem>>, %arg7: memref<4x1x128xf32, #tpu.memory_space<vmem>>, %arg8: memref<8x128xf32, #tpu.memory_space<vmem>>, %arg9: memref<8x128xf32, #tpu.memory_space<vmem>>) attributes {dimension_semantics = [#tpu.dimension_semantics<parallel>, #tpu.dimension_semantics<parallel>], iteration_bounds = array<i64: 1, 1>, scalar_prefetch = 0 : i64, scratch_operands = 0 : i64, tpu.core_type = #tpu.core_type<tc>, window_params = [{transform_indices = @transform_0, window_bounds = array<i64: 8, 128>}, {transform_indices = @transform_1, window_bounds = array<i64: 8, 128>}, {transform_indices = @transform_2, window_bounds = array<i64: 8, 128>}, {transform_indices = @transform_3, window_bounds = array<i64: 4, 128, 128>}, {transform_indices = @transform_4, window_bounds = array<i64: 4, 128, 128>}, {transform_indices = @transform_5, window_bounds = array<i64: 4, 1, 128>}, {transform_indices = @transform_6, window_bounds = array<i64: 8, 128>}, {transform_indices = @transform_7, window_bounds = array<i64: 8, 128>}]} {
    %c0 = arith.constant 0 : index
    %c0_0 = arith.constant 0 : index
    %0 = vector.load %arg2[%c0, %c0_0] : memref<8x128xbf16, #tpu.memory_space<vmem>>, vector<8x128xbf16>
    %c0_1 = arith.constant 0 : index
    %c0_2 = arith.constant 0 : index
    %1 = vector.load %arg3[%c0_1, %c0_2] : memref<8x128xbf16, #tpu.memory_space<vmem>>, vector<8x128xbf16>
    %c0_3 = arith.constant 0 : index
    %c0_4 = arith.constant 0 : index
    %c0_5 = arith.constant 0 : index
    %2 = vector.load %arg5[%c0_3, %c0_4, %c0_5] : memref<4x128x128xbf16, #tpu.memory_space<vmem>>, vector<1x128x128xbf16>
    %3 = vector.shape_cast %2 : vector<1x128x128xbf16> to vector<128x128xbf16>
    %cst = arith.constant dense<0.000000e+00> : vector<8x128xf32>
    %4 = tpu.matmul %0, %3, %cst {dimension_numbers = #tpu.dot_dimension_numbers<[1], [0], [0], [1], [0, 0, 1, 1], [], []>} : vector<8x128xbf16>, vector<128x128xbf16>, vector<8x128xf32> -> vector<8x128xf32>
    %c0_6 = arith.constant 0 : index
    %c0_7 = arith.constant 0 : index
    %c0_8 = arith.constant 0 : index
    %5 = vector.load %arg6[%c0_6, %c0_7, %c0_8] : memref<4x128x128xbf16, #tpu.memory_space<vmem>>, vector<1x128x128xbf16>
    %6 = vector.shape_cast %5 : vector<1x128x128xbf16> to vector<128x128xbf16>
    %cst_9 = arith.constant dense<0.000000e+00> : vector<8x128xf32>
    %7 = tpu.matmul %1, %6, %cst_9 {dimension_numbers = #tpu.dot_dimension_numbers<[1], [0], [0], [1], [0, 0, 1, 1], [], []>} : vector<8x128xbf16>, vector<128x128xbf16>, vector<8x128xf32> -> vector<8x128xf32>
    %8 = arith.addf %4, %7 : vector<8x128xf32>
    %c0_10 = arith.constant 0 : index
    %c0_11 = arith.constant 0 : index
    %c0_12 = arith.constant 0 : index
    %9 = vector.load %arg7[%c0_10, %c0_11, %c0_12] : memref<4x1x128xf32, #tpu.memory_space<vmem>>, vector<1x1x128xf32>
    %10 = vector.shape_cast %9 : vector<1x1x128xf32> to vector<1x128xf32>
    %11 = vector.broadcast %10 : vector<1x128xf32> to vector<8x128xf32>
    %12 = arith.addf %8, %11 : vector<8x128xf32>
    %cst_13 = arith.constant 5.000000e-01 : f32
    %13 = vector.broadcast %cst_13 : f32 to vector<8x128xf32>
    %14 = arith.mulf %13, %12 : vector<8x128xf32>
    %15 = math.tanh %14 : vector<8x128xf32>
    %cst_14 = arith.constant 1.000000e+00 : f32
    %16 = vector.broadcast %cst_14 : f32 to vector<8x128xf32>
    %17 = arith.addf %15, %16 : vector<8x128xf32>
    %cst_15 = arith.constant 5.000000e-01 : f32
    %18 = vector.broadcast %cst_15 : f32 to vector<8x128xf32>
    %19 = arith.mulf %18, %17 : vector<8x128xf32>
    %c1 = arith.constant 1 : index
    %c0_16 = arith.constant 0 : index
    %c0_17 = arith.constant 0 : index
    %20 = vector.load %arg5[%c1, %c0_16, %c0_17] : memref<4x128x128xbf16, #tpu.memory_space<vmem>>, vector<1x128x128xbf16>
    %21 = vector.shape_cast %20 : vector<1x128x128xbf16> to vector<128x128xbf16>
    %cst_18 = arith.constant dense<0.000000e+00> : vector<8x128xf32>
    %22 = tpu.matmul %0, %21, %cst_18 {dimension_numbers = #tpu.dot_dimension_numbers<[1], [0], [0], [1], [0, 0, 1, 1], [], []>} : vector<8x128xbf16>, vector<128x128xbf16>, vector<8x128xf32> -> vector<8x128xf32>
    %c1_19 = arith.constant 1 : index
    %c0_20 = arith.constant 0 : index
    %c0_21 = arith.constant 0 : index
    %23 = vector.load %arg6[%c1_19, %c0_20, %c0_21] : memref<4x128x128xbf16, #tpu.memory_space<vmem>>, vector<1x128x128xbf16>
    %24 = vector.shape_cast %23 : vector<1x128x128xbf16> to vector<128x128xbf16>
    %cst_22 = arith.constant dense<0.000000e+00> : vector<8x128xf32>
    %25 = tpu.matmul %1, %24, %cst_22 {dimension_numbers = #tpu.dot_dimension_numbers<[1], [0], [0], [1], [0, 0, 1, 1], [], []>} : vector<8x128xbf16>, vector<128x128xbf16>, vector<8x128xf32> -> vector<8x128xf32>
    %26 = arith.addf %22, %25 : vector<8x128xf32>
    %c1_23 = arith.constant 1 : index
    %c0_24 = arith.constant 0 : index
    %c0_25 = arith.constant 0 : index
    %27 = vector.load %arg7[%c1_23, %c0_24, %c0_25] : memref<4x1x128xf32, #tpu.memory_space<vmem>>, vector<1x1x128xf32>
    %28 = vector.shape_cast %27 : vector<1x1x128xf32> to vector<1x128xf32>
    %29 = vector.broadcast %28 : vector<1x128xf32> to vector<8x128xf32>
    %30 = arith.addf %26, %29 : vector<8x128xf32>
    %cst_26 = arith.constant 5.000000e-01 : f32
    %31 = vector.broadcast %cst_26 : f32 to vector<8x128xf32>
    %32 = arith.mulf %31, %30 : vector<8x128xf32>
    %33 = math.tanh %32 : vector<8x128xf32>
    %cst_27 = arith.constant 1.000000e+00 : f32
    %34 = vector.broadcast %cst_27 : f32 to vector<8x128xf32>
    %35 = arith.addf %33, %34 : vector<8x128xf32>
    %cst_28 = arith.constant 5.000000e-01 : f32
    %36 = vector.broadcast %cst_28 : f32 to vector<8x128xf32>
    %37 = arith.mulf %36, %35 : vector<8x128xf32>
    %c2 = arith.constant 2 : index
    %c0_29 = arith.constant 0 : index
    %c0_30 = arith.constant 0 : index
    %38 = vector.load %arg5[%c2, %c0_29, %c0_30] : memref<4x128x128xbf16, #tpu.memory_space<vmem>>, vector<1x128x128xbf16>
    %39 = vector.shape_cast %38 : vector<1x128x128xbf16> to vector<128x128xbf16>
    %cst_31 = arith.constant dense<0.000000e+00> : vector<8x128xf32>
    %40 = tpu.matmul %0, %39, %cst_31 {dimension_numbers = #tpu.dot_dimension_numbers<[1], [0], [0], [1], [0, 0, 1, 1], [], []>} : vector<8x128xbf16>, vector<128x128xbf16>, vector<8x128xf32> -> vector<8x128xf32>
    %c2_32 = arith.constant 2 : index
    %c0_33 = arith.constant 0 : index
    %c0_34 = arith.constant 0 : index
    %41 = vector.load %arg6[%c2_32, %c0_33, %c0_34] : memref<4x128x128xbf16, #tpu.memory_space<vmem>>, vector<1x128x128xbf16>
    %42 = vector.shape_cast %41 : vector<1x128x128xbf16> to vector<128x128xbf16>
    %cst_35 = arith.constant dense<0.000000e+00> : vector<8x128xf32>
    %43 = tpu.matmul %1, %42, %cst_35 {dimension_numbers = #tpu.dot_dimension_numbers<[1], [0], [0], [1], [0, 0, 1, 1], [], []>} : vector<8x128xbf16>, vector<128x128xbf16>, vector<8x128xf32> -> vector<8x128xf32>
    %44 = arith.addf %40, %43 : vector<8x128xf32>
    %c2_36 = arith.constant 2 : index
    %c0_37 = arith.constant 0 : index
    %c0_38 = arith.constant 0 : index
    %45 = vector.load %arg7[%c2_36, %c0_37, %c0_38] : memref<4x1x128xf32, #tpu.memory_space<vmem>>, vector<1x1x128xf32>
    %46 = vector.shape_cast %45 : vector<1x1x128xf32> to vector<1x128xf32>
    %47 = vector.broadcast %46 : vector<1x128xf32> to vector<8x128xf32>
    %48 = arith.addf %44, %47 : vector<8x128xf32>
    %49 = math.tanh %48 : vector<8x128xf32>
    %c3 = arith.constant 3 : index
    %c0_39 = arith.constant 0 : index
    %c0_40 = arith.constant 0 : index
    %50 = vector.load %arg5[%c3, %c0_39, %c0_40] : memref<4x128x128xbf16, #tpu.memory_space<vmem>>, vector<1x128x128xbf16>
    %51 = vector.shape_cast %50 : vector<1x128x128xbf16> to vector<128x128xbf16>
    %cst_41 = arith.constant dense<0.000000e+00> : vector<8x128xf32>
    %52 = tpu.matmul %0, %51, %cst_41 {dimension_numbers = #tpu.dot_dimension_numbers<[1], [0], [0], [1], [0, 0, 1, 1], [], []>} : vector<8x128xbf16>, vector<128x128xbf16>, vector<8x128xf32> -> vector<8x128xf32>
    %c3_42 = arith.constant 3 : index
    %c0_43 = arith.constant 0 : index
    %c0_44 = arith.constant 0 : index
    %53 = vector.load %arg6[%c3_42, %c0_43, %c0_44] : memref<4x128x128xbf16, #tpu.memory_space<vmem>>, vector<1x128x128xbf16>
    %54 = vector.shape_cast %53 : vector<1x128x128xbf16> to vector<128x128xbf16>
    %cst_45 = arith.constant dense<0.000000e+00> : vector<8x128xf32>
    %55 = tpu.matmul %1, %54, %cst_45 {dimension_numbers = #tpu.dot_dimension_numbers<[1], [0], [0], [1], [0, 0, 1, 1], [], []>} : vector<8x128xbf16>, vector<128x128xbf16>, vector<8x128xf32> -> vector<8x128xf32>
    %56 = arith.addf %52, %55 : vector<8x128xf32>
    %c3_46 = arith.constant 3 : index
    %c0_47 = arith.constant 0 : index
    %c0_48 = arith.constant 0 : index
    %57 = vector.load %arg7[%c3_46, %c0_47, %c0_48] : memref<4x1x128xf32, #tpu.memory_space<vmem>>, vector<1x1x128xf32>
    %58 = vector.shape_cast %57 : vector<1x1x128xf32> to vector<1x128xf32>
    %59 = vector.broadcast %58 : vector<1x128xf32> to vector<8x128xf32>
    %60 = arith.addf %56, %59 : vector<8x128xf32>
    %cst_49 = arith.constant 5.000000e-01 : f32
    %61 = vector.broadcast %cst_49 : f32 to vector<8x128xf32>
    %62 = arith.mulf %61, %60 : vector<8x128xf32>
    %63 = math.tanh %62 : vector<8x128xf32>
    %cst_50 = arith.constant 1.000000e+00 : f32
    %64 = vector.broadcast %cst_50 : f32 to vector<8x128xf32>
    %65 = arith.addf %63, %64 : vector<8x128xf32>
    %cst_51 = arith.constant 5.000000e-01 : f32
    %66 = vector.broadcast %cst_51 : f32 to vector<8x128xf32>
    %67 = arith.mulf %66, %65 : vector<8x128xf32>
    %c0_52 = arith.constant 0 : index
    %c0_53 = arith.constant 0 : index
    %68 = vector.load %arg4[%c0_52, %c0_53] : memref<8x128xf32, #tpu.memory_space<vmem>>, vector<8x128xf32>
    %69 = arith.mulf %37, %68 : vector<8x128xf32>
    %70 = arith.mulf %19, %49 : vector<8x128xf32>
    %71 = arith.addf %69, %70 : vector<8x128xf32>
    %72 = math.tanh %71 : vector<8x128xf32>
    %73 = arith.mulf %67, %72 : vector<8x128xf32>
    %c0_54 = arith.constant 0 : index
    %c0_55 = arith.constant 0 : index
    %74 = vector.load %arg8[%c0_54, %c0_55] : memref<8x128xf32, #tpu.memory_space<vmem>>, vector<8x128xf32>
    tpu.vector_store %arg8[%c0_54, %c0_55], %73 {strides = array<i32>} : memref<8x128xf32, #tpu.memory_space<vmem>>, vector<8x128xf32>,
    %c0_56 = arith.constant 0 : index
    %c0_57 = arith.constant 0 : index
    %75 = vector.load %arg9[%c0_56, %c0_57] : memref<8x128xf32, #tpu.memory_space<vmem>>, vector<8x128xf32>
    tpu.vector_store %arg9[%c0_56, %c0_57], %71 {strides = array<i32>} : memref<8x128xf32, #tpu.memory_space<vmem>>, vector<8x128xf32>,
    return
  }
  func.func @transform_0(%arg0: i32, %arg1: i32) -> (i32, i32) {
    %c0_i32 = arith.constant 0 : i32
    %c0_i32_0 = arith.constant 0 : i32
    return %arg0, %c0_i32 : i32, i32
  }
  func.func @transform_1(%arg0: i32, %arg1: i32) -> (i32, i32) {
    %c0_i32 = arith.constant 0 : i32
    %c0_i32_0 = arith.constant 0 : i32
    return %arg0, %c0_i32 : i32, i32
  }
  func.func @transform_2(%arg0: i32, %arg1: i32) -> (i32, i32) {
    %c0_i32 = arith.constant 0 : i32
    return %arg0, %arg1 : i32, i32
  }
  func.func @transform_3(%arg0: i32, %arg1: i32) -> (i32, i32, i32) {
    %c0_i32 = arith.constant 0 : i32
    %c0_i32_0 = arith.constant 0 : i32
    %c0_i32_1 = arith.constant 0 : i32
    return %c0_i32, %c0_i32_0, %arg1 : i32, i32, i32
  }
  func.func @transform_4(%arg0: i32, %arg1: i32) -> (i32, i32, i32) {
    %c0_i32 = arith.constant 0 : i32
    %c0_i32_0 = arith.constant 0 : i32
    %c0_i32_1 = arith.constant 0 : i32
    return %c0_i32, %c0_i32_0, %arg1 : i32, i32, i32
  }
  func.func @transform_5(%arg0: i32, %arg1: i32) -> (i32, i32, i32) {
    %c0_i32 = arith.constant 0 : i32
    %c0_i32_0 = arith.constant 0 : i32
    %c0_i32_1 = arith.constant 0 : i32
    return %c0_i32, %c0_i32_0, %arg1 : i32, i32, i32
  }
  func.func @transform_6(%arg0: i32, %arg1: i32) -> (i32, i32) {
    %c0_i32 = arith.constant 0 : i32
    return %arg0, %arg1 : i32, i32
  }
  func.func @transform_7(%arg0: i32, %arg1: i32) -> (i32, i32) {
    %c0_i32 = arith.constant 0 : i32
    return %arg0, %arg1 : i32, i32
  }
}

</mosaic_0001>

<bundles_post_ra>
// kernel: lstm_cell.1
= control target key start
LH: loop header
LB: loop body
LE: loop exit
PB: predicated region body
PF: predicated region fallthrough
CT: control target
= control target key end

     0   :  { %13 = vsyncpa [#allocation3], 0  ;;  %s1626_s0 = inlined_call_operand.vmem [shape: bf16[8,128], index: 0, kind: input, shape index: {}]   ;;  %s1627_s1 = inlined_call_operand.vmem [shape: bf16[8,128], index: 1, kind: input, shape index: {}]   ;;  %s1628_s2 = inlined_call_operand.vmem [shape: f32[8,128], index: 2, kind: input, shape index: {}, may-alias: {2,7}]   ;;  %s1629_s3 = inlined_call_operand.hbm [shape: bf16[4,128,128], index: 3, kind: input, shape index: {}]   ;;  %s1630_s4 = inlined_call_operand.hbm [shape: bf16[4,128,128], index: 4, kind: input, shape index: {}]   ;;  %s1631_s5 = inlined_call_operand.vmem [shape: f32[4,1,128], index: 5, kind: input, shape index: {}]   ;;  %s1632_s6 = inlined_call_operand.hbm [shape: f32[8,128], index: 6, kind: output, shape index: {0}]   ;;  %s1633_s7 = inlined_call_operand.vmem [shape: f32[8,128], index: 7, kind: output, shape index: {1}, may-alias: {2,7}]  }
   0x1   :  { %14 = vsyncpa [#allocation6], 0 }
   0x2   :  { %15 = vsyncpa [#allocation4], 0  ;;  %s1427_s24 = smov [#allocation2]   ;;  %s1355_s28 = scalar_lea.hbm %s1629_s3, 4096 }
   0x3   :  { %s27_s25 = sshll.u32 %s1427_s24, 4  ;;  %p1356_p0 = scmp.ne.s32.totalorder %s1629_s3, %s1355_s28  ;;  %s28_s25 = int_to_ptr.vmem [resolvable:$true] %s27_s25 }
   0x4   :  { %p1359_p1 = scmp.lt.u32.totalorder %s1355_s28, %s1629_s3 }
   0x6   :  { %p1361_p2 = pnand %p1359_p1, %p1356_p0 }
   0x8   :  { %1364 = shalt.err (!%p1361_p2)
}
   0x9   :  { %s1365_s10 = scalar_lea.vmem %s28_s25, 4096  ;;  %p1370_p4 = scmp.lt.s32.totalorder %s28_s25, %s28_s25 }
   0xa   :  { %p1366_p3 = scmp.ne.s32.totalorder %s28_s25, %s1365_s10  ;;  %p1371_p5 = scmp.lt.s32.totalorder %s1365_s10, %s1365_s10 }
   0xc   :  { %p1372_p6 = por %p1371_p5, %p1370_p4 }
   0xe   :  { %p1373_p7 = pnand %p1372_p6, %p1366_p3 }
  0x10   :  { %1376 = shalt.err (!%p1373_p7)
}
  0x11   :  { %s1428_s11 = smov 64   ;;  %s1429_s12 = smov 4  }
  0x12   :  { %33 = dma.hbm_to_vmem [thread:$0]  %s1629_s3, 4096, %s28_s25, [#allocation3], %s1428_s11, %s1428_s11, %s1429_s12  }
  0x13   :  { %s1430_s15 = smov [#allocation5]   ;;  %s1377_s19 = scalar_lea.hbm %s1630_s4, 4096 }
  0x14   :  { %s39_s16 = sshll.u32 %s1430_s15, 4  ;;  %p1378_p8 = scmp.ne.s32.totalorder %s1630_s4, %s1377_s19  ;;  %s40_s16 = int_to_ptr.vmem [resolvable:$true] %s39_s16 }
  0x15   :  { %p1381_p9 = scmp.lt.u32.totalorder %s1377_s19, %s1630_s4 }
  0x17   :  { %p1383_p10 = pnand %p1381_p9, %p1378_p8 }
  0x19   :  { %1386 = shalt.err (!%p1383_p10)
}
  0x1a   :  { %s1387_s24 = scalar_lea.vmem %s40_s16, 4096  ;;  %p1392_p12 = scmp.lt.s32.totalorder %s40_s16, %s40_s16 }
  0x1b   :  { %p1388_p11 = scmp.ne.s32.totalorder %s40_s16, %s1387_s24  ;;  %p1393_p13 = scmp.lt.s32.totalorder %s1387_s24, %s1387_s24 }
  0x1d   :  { %p1394_p0 = por %p1393_p13, %p1392_p12 }
  0x1f   :  { %p1395_p1 = pnand %p1394_p0, %p1388_p11 }
  0x21   :  { %1398 = shalt.err (!%p1395_p1)
}
  0x22   :  { %45 = dma.hbm_to_vmem [thread:$0]  %s1630_s4, 4096, %s40_s16, [#allocation6], %s1428_s11, %s1428_s11, %s1429_s12  }
  0x23   :  { %1421 = dma.done.wait [#allocation3], 4096  }
  0x24   :  { %1422 = vsyncadd [#allocation3], 4294963200 }
  0x25   :  { %1423 = dma.done.wait [#allocation6], 4096  }
  0x26   :  { %1424 = vsyncadd [#allocation6], 4294963200  ;;  %v1431_v0 = vmov 0.0   ;;  %vm1432_vm0 = vmmov 0   ;;  %v1281_v1 = vld [vmem:[#allocation5] sm:$0xff]   ;;  %v1283_v3 = vld [vmem:[#allocation5 + $0x8] sm:$0xff]  }
  0x27   :  { %1114 = vmatprep.subr.bf16.mxu0 %v1431_v0  ;;  %1134 = vmatprep.subr.bf16.mxu1 %v1431_v0  ;;  %v1282_v2 = vld [vmem:[#allocation2] sm:$0xff]   ;;  %v1284_v4 = vld [vmem:[#allocation2 + $0x8] sm:$0xff]   ;;  %v1285_v5 = vld [vmem:[#allocation5 + $0x10] sm:$0xff]  }
  0x28   :  { %1130 = vmatprep.mubr.msk.bf16.mxu0 %vm1432_vm0, %v1431_v0  ;;  %1150 = vmatprep.mubr.msk.bf16.mxu1 %vm1432_vm0, %v1431_v0  ;;  %v1286_v6 = vld [vmem:[#allocation2 + $0x10] sm:$0xff]   ;;  %v1287_v7 = vld [vmem:[#allocation5 + $0x18] sm:$0xff]   ;;  %v1289_v9 = vld [vmem:[#allocation5 + $0x20] sm:$0xff]  }
  0x29   :  { %1115 = vmatpush3.bf16.msra.mxu0 %v1281_v1  ;;  %1135 = vmatpush3.bf16.msra.mxu1 %v1282_v2  ;;  %v1288_v8 = vld [vmem:[#allocation2 + $0x18] sm:$0xff]   ;;  %v1290_v10 = vld [vmem:[#allocation2 + $0x20] sm:$0xff]   ;;  %v1291_v11 = vld [vmem:[#allocation5 + $0x28] sm:$0xff]  }
  0x2a   :  { %1116 = vmatprep.subr.bf16.mxu0 %v1431_v0  ;;  %1136 = vmatprep.subr.bf16.mxu1 %v1431_v0  ;;  %v1292_v12 = vld [vmem:[#allocation2 + $0x28] sm:$0xff]   ;;  %v1293_v13 = vld [vmem:[#allocation5 + $0x30] sm:$0xff]   ;;  %v1295_v15 = vld [vmem:[#allocation5 + $0x38] sm:$0xff]  }
  0x2b   :  { %v1294_v14 = vld [vmem:[#allocation2 + $0x30] sm:$0xff]   ;;  %v1296_v16 = vld [vmem:[#allocation2 + $0x38] sm:$0xff]   ;;  %v1297_v19 = vld [vmem:[#allocation5 + $0x40] sm:$0xff]  }
  0x2c   :  { %v1521_v17 = vld [vmem:[%s1627_s1] sm:$0xf]  ;;  %v1298_v20 = vld [vmem:[#allocation2 + $0x40] sm:$0xff]   ;;  %v1299_v21 = vld [vmem:[#allocation5 + $0x48] sm:$0xff]  }
  0x2d   :  { %1117 = vmatpush3.bf16.msra.mxu0 %v1283_v3  ;;  %1137 = vmatpush3.bf16.msra.mxu1 %v1284_v4  ;;  %v1526_v18 = vld [vmem:[%s1626_s0] sm:$0xf]  ;;  %v1300_v22 = vld [vmem:[#allocation2 + $0x48] sm:$0xff]   ;;  %v1301_v23 = vld [vmem:[#allocation5 + $0x50] sm:$0xff]  }
  0x2e   :  { %1118 = vmatprep.subr.bf16.mxu0 %v1431_v0  ;;  %1138 = vmatprep.subr.bf16.mxu1 %v1431_v0  ;;  %v1302_v24 = vld [vmem:[#allocation2 + $0x50] sm:$0xff]   ;;  %v1303_v25 = vld [vmem:[#allocation5 + $0x58] sm:$0xff]   ;;  %v1305_v27 = vld [vmem:[#allocation5 + $0x60] sm:$0xff]  }
  0x2f   :  { %v1304_v26 = vld [vmem:[#allocation2 + $0x58] sm:$0xff]   ;;  %v1306_v28 = vld [vmem:[#allocation2 + $0x60] sm:$0xff]   ;;  %v1307_v29 = vld [vmem:[#allocation5 + $0x68] sm:$0xff]  }
  0x30   :  { %v1308_v30 = vld [vmem:[#allocation2 + $0x68] sm:$0xff]   ;;  %v1309_v31 = vld [vmem:[#allocation5 + $0x70] sm:$0xff]   ;;  %v1311_v33 = vld [vmem:[#allocation5 + $0x78] sm:$0xff]  }
  0x31   :  { %1119 = vmatpush3.bf16.msra.mxu0 %v1285_v5  ;;  %1139 = vmatpush3.bf16.msra.mxu1 %v1286_v6  ;;  %v1310_v32 = vld [vmem:[#allocation2 + $0x70] sm:$0xff]   ;;  %v1312_v34 = vld [vmem:[#allocation2 + $0x78] sm:$0xff]   ;;  %v1313_v35 = vld [vmem:[#allocation5 + $0x80] sm:$0xff]  }
  0x32   :  { %1120 = vmatprep.subr.bf16.mxu0 %v1431_v0  ;;  %1140 = vmatprep.subr.bf16.mxu1 %v1431_v0  ;;  %v1314_v36 = vld [vmem:[#allocation2 + $0x80] sm:$0xff]   ;;  %v1315_v37 = vld [vmem:[#allocation5 + $0x88] sm:$0xff]   ;;  %v1317_v39 = vld [vmem:[#allocation5 + $0x90] sm:$0xff]  }
  0x33   :  { %v1316_v38 = vld [vmem:[#allocation2 + $0x88] sm:$0xff]   ;;  %v1318_v40 = vld [vmem:[#allocation2 + $0x90] sm:$0xff]   ;;  %v1319_v41 = vld [vmem:[#allocation5 + $0x98] sm:$0xff]  }
  0x34   :  { %v1320_v42 = vld [vmem:[#allocation2 + $0x98] sm:$0xff]   ;;  %v1321_v43 = vld [vmem:[#allocation5 + $0xa0] sm:$0xff]   ;;  %v1323_v45 = vld [vmem:[#allocation5 + $0xa8] sm:$0xff]  }
  0x35   :  { %1121 = vmatpush3.bf16.msra.mxu0 %v1287_v7  ;;  %1141 = vmatpush3.bf16.msra.mxu1 %v1288_v8  ;;  %v1322_v44 = vld [vmem:[#allocation2 + $0xa0] sm:$0xff]   ;;  %v1324_v46 = vld [vmem:[#allocation2 + $0xa8] sm:$0xff]   ;;  %v1325_v47 = vld [vmem:[#allocation5 + $0xb0] sm:$0xff]  }
  0x36   :  { %1122 = vmatprep.subr.bf16.mxu0 %v1431_v0  ;;  %1142 = vmatprep.subr.bf16.mxu1 %v1431_v0  ;;  %v1326_v48 = vld [vmem:[#allocation2 + $0xb0] sm:$0xff]   ;;  %v1327_v49 = vld [vmem:[#allocation5 + $0xb8] sm:$0xff]   ;;  %v1329_v51 = vld [vmem:[#allocation5 + $0xc0] sm:$0xff]  }
  0x37   :  { %v1328_v50 = vld [vmem:[#allocation2 + $0xb8] sm:$0xff]   ;;  %v1330_v52 = vld [vmem:[#allocation2 + $0xc0] sm:$0xff]   ;;  %v1331_v53 = vld [vmem:[#allocation5 + $0xc8] sm:$0xff]  }
  0x38   :  { %v1332_v54 = vld [vmem:[#allocation2 + $0xc8] sm:$0xff]   ;;  %v1333_v55 = vld [vmem:[#allocation5 + $0xd0] sm:$0xff]   ;;  %v1335_v57 = vld [vmem:[#allocation5 + $0xd8] sm:$0xff]  }
  0x39   :  { %1123 = vmatpush3.bf16.msra.mxu0 %v1289_v9  ;;  %1143 = vmatpush3.bf16.msra.mxu1 %v1290_v10  ;;  %v1334_v56 = vld [vmem:[#allocation2 + $0xd0] sm:$0xff]   ;;  %v1336_v58 = vld [vmem:[#allocation2 + $0xd8] sm:$0xff]   ;;  %v1337_v59 = vld [vmem:[#allocation5 + $0xe0] sm:$0xff]  }
  0x3a   :  { %1124 = vmatprep.subr.bf16.mxu0 %v1431_v0  ;;  %1144 = vmatprep.subr.bf16.mxu1 %v1431_v0  ;;  %v1338_v60 = vld [vmem:[#allocation2 + $0xe0] sm:$0xff]   ;;  %v1339_v61 = vld [vmem:[#allocation5 + $0xe8] sm:$0xff]   ;;  %v1341_v63 = vld [vmem:[#allocation5 + $0xf0] sm:$0xff]  }
  0x3b   :  { %v1340_v62 = vld [vmem:[#allocation2 + $0xe8] sm:$0xff]   ;;  %v1342_v1 = vld [vmem:[#allocation2 + $0xf0] sm:$0xff]   ;;  %v1343_v2 = vld [vmem:[#allocation5 + $0xf8] sm:$0xff]  }
  0x3c   :  { %v1344_v3 = vld [vmem:[#allocation2 + $0xf8] sm:$0xff]  }
  0x3d   :  { %1125 = vmatpush3.bf16.msra.mxu0 %v1291_v11  ;;  %1145 = vmatpush3.bf16.msra.mxu1 %v1292_v12 }
  0x3e   :  { %1126 = vmatprep.subr.bf16.mxu0 %v1431_v0  ;;  %1146 = vmatprep.subr.bf16.mxu1 %v1431_v0 }
  0x41   :  { %1127 = vmatpush3.bf16.msra.mxu0 %v1293_v13  ;;  %1147 = vmatpush3.bf16.msra.mxu1 %v1294_v14 }
  0x42   :  { %1128 = vmatprep.subr.bf16.mxu0 %v1431_v0  ;;  %1148 = vmatprep.subr.bf16.mxu1 %v1431_v0 }
  0x45   :  { %1129 = vmatpush3.bf16.msra.mxu0 %v1295_v15  ;;  %1149 = vmatpush3.bf16.msra.mxu1 %v1296_v16 }
  0x46   :  { %1154 = vmatprep.subr.bf16.mxu0 %v1431_v0  ;;  %1174 = vmatprep.subr.bf16.mxu1 %v1431_v0 }
  0x48   :  { %1131 = vmatmul.mubr.bf16.vlgmr.msra.gmra.mrb[0].mxu0 %v1521_v17  ;;  %1151 = vmatmul.mubr.bf16.vlgmr.msra.gmra.mrb[0].mxu1 %v1526_v18 }
  0x49   :  { %1155 = vmatpush3.bf16.msra.mxu0 %v1297_v19  ;;  %1175 = vmatpush3.bf16.msra.mxu1 %v1298_v20 }
  0x4a   :  { %1156 = vmatprep.subr.bf16.mxu0 %v1431_v0  ;;  %1176 = vmatprep.subr.bf16.mxu1 %v1431_v0 }
  0x4b   :  { %1170 = vmatprep.mubr.msk.bf16.mxu0 %vm1432_vm0, %v1431_v0  ;;  %1190 = vmatprep.mubr.msk.bf16.mxu1 %vm1432_vm0, %v1431_v0 }
  0x4d   :  { %1157 = vmatpush3.bf16.msra.mxu0 %v1299_v21  ;;  %1177 = vmatpush3.bf16.msra.mxu1 %v1300_v22  ;;  %v987_v22 = vld [vmem:[%s1631_s5] ss:$0 sm:$0xff] }
  0x4e   :  { %1158 = vmatprep.subr.bf16.mxu0 %v1431_v0  ;;  %1178 = vmatprep.subr.bf16.mxu1 %v1431_v0 }
  0x51   :  { %1159 = vmatpush3.bf16.msra.mxu0 %v1301_v23  ;;  %1179 = vmatpush3.bf16.msra.mxu1 %v1302_v24 }
  0x52   :  { %1160 = vmatprep.subr.bf16.mxu0 %v1431_v0  ;;  %1180 = vmatprep.subr.bf16.mxu1 %v1431_v0 }
  0x55   :  { %1161 = vmatpush3.bf16.msra.mxu0 %v1303_v25  ;;  %1181 = vmatpush3.bf16.msra.mxu1 %v1304_v26 }
  0x56   :  { %1162 = vmatprep.subr.bf16.mxu0 %v1431_v0  ;;  %1182 = vmatprep.subr.bf16.mxu1 %v1431_v0 }
  0x59   :  { %1163 = vmatpush3.bf16.msra.mxu0 %v1305_v27  ;;  %1183 = vmatpush3.bf16.msra.mxu1 %v1306_v28 }
  0x5a   :  { %1164 = vmatprep.subr.bf16.mxu0 %v1431_v0  ;;  %1184 = vmatprep.subr.bf16.mxu1 %v1431_v0 }
  0x5d   :  { %1165 = vmatpush3.bf16.msra.mxu0 %v1307_v29  ;;  %1185 = vmatpush3.bf16.msra.mxu1 %v1308_v30  ;;  %v1023_v29 = vld [vmem:[%s1631_s5 + $0x2] ss:$0 sm:$0xff] }
  0x5e   :  { %1166 = vmatprep.subr.bf16.mxu0 %v1431_v0  ;;  %1186 = vmatprep.subr.bf16.mxu1 %v1431_v0 }
  0x61   :  { %1167 = vmatpush3.bf16.msra.mxu0 %v1309_v31  ;;  %1187 = vmatpush3.bf16.msra.mxu1 %v1310_v32 }
  0x62   :  { %1168 = vmatprep.subr.bf16.mxu0 %v1431_v0  ;;  %1188 = vmatprep.subr.bf16.mxu1 %v1431_v0 }
  0x65   :  { %1169 = vmatpush3.bf16.msra.mxu0 %v1311_v33  ;;  %1189 = vmatpush3.bf16.msra.mxu1 %v1312_v34 }
  0x66   :  { %1194 = vmatprep.subr.bf16.mxu0 %v1431_v0  ;;  %1214 = vmatprep.subr.bf16.mxu1 %v1431_v0 }
  0x68   :  { %1171 = vmatmul.mubr.bf16.vlgmr.msra.gmra.mrb[4].mxu0 %v1521_v17  ;;  %1191 = vmatmul.mubr.bf16.vlgmr.msra.gmra.mrb[4].mxu1 %v1526_v18 }
  0x69   :  { %1195 = vmatpush3.bf16.msra.mxu0 %v1313_v35  ;;  %1215 = vmatpush3.bf16.msra.mxu1 %v1314_v36 }
  0x6a   :  { %1196 = vmatprep.subr.bf16.mxu0 %v1431_v0  ;;  %1216 = vmatprep.subr.bf16.mxu1 %v1431_v0 }
  0x6b   :  { %1210 = vmatprep.mubr.msk.bf16.mxu0 %vm1432_vm0, %v1431_v0  ;;  %1230 = vmatprep.mubr.msk.bf16.mxu1 %vm1432_vm0, %v1431_v0 }
  0x6d   :  { %1197 = vmatpush3.bf16.msra.mxu0 %v1315_v37  ;;  %1217 = vmatpush3.bf16.msra.mxu1 %v1316_v38 }
  0x6e   :  { %1198 = vmatprep.subr.bf16.mxu0 %v1431_v0  ;;  %1218 = vmatprep.subr.bf16.mxu1 %v1431_v0 }
  0x71   :  { %1199 = vmatpush3.bf16.msra.mxu0 %v1317_v39  ;;  %1219 = vmatpush3.bf16.msra.mxu1 %v1318_v40 }
  0x72   :  { %1200 = vmatprep.subr.bf16.mxu0 %v1431_v0  ;;  %1220 = vmatprep.subr.bf16.mxu1 %v1431_v0 }
  0x75   :  { %1201 = vmatpush3.bf16.msra.mxu0 %v1319_v41  ;;  %1221 = vmatpush3.bf16.msra.mxu1 %v1320_v42 }
  0x76   :  { %1202 = vmatprep.subr.bf16.mxu0 %v1431_v0  ;;  %1222 = vmatprep.subr.bf16.mxu1 %v1431_v0 }
  0x79   :  { %1203 = vmatpush3.bf16.msra.mxu0 %v1321_v43  ;;  %1223 = vmatpush3.bf16.msra.mxu1 %v1322_v44  ;;  %v943_v43 = vld [vmem:[%s1628_s2] sm:$0xff]  ;;  %s1433_s2 = smov [#allocation7]  }
  0x7a   :  { %1204 = vmatprep.subr.bf16.mxu0 %v1431_v0  ;;  %1224 = vmatprep.subr.bf16.mxu1 %v1431_v0 }
  0x7d   :  { %1205 = vmatpush3.bf16.msra.mxu0 %v1323_v45  ;;  %1225 = vmatpush3.bf16.msra.mxu1 %v1324_v46 }
  0x7e   :  { %1206 = vmatprep.subr.bf16.mxu0 %v1431_v0  ;;  %1226 = vmatprep.subr.bf16.mxu1 %v1431_v0 }
  0x81   :  { %1207 = vmatpush3.bf16.msra.mxu0 %v1325_v47  ;;  %1227 = vmatpush3.bf16.msra.mxu1 %v1326_v48 }
  0x82   :  { %1208 = vmatprep.subr.bf16.mxu0 %v1431_v0  ;;  %1228 = vmatprep.subr.bf16.mxu1 %v1431_v0 }
  0x85   :  { %1209 = vmatpush3.bf16.msra.mxu0 %v1327_v49  ;;  %1229 = vmatpush3.bf16.msra.mxu1 %v1328_v50 }
  0x86   :  { %1234 = vmatprep.subr.bf16.mxu0 %v1431_v0  ;;  %1254 = vmatprep.subr.bf16.mxu1 %v1431_v0 }
  0x88   :  { %1211 = vmatmul.mubr.bf16.vlgmr.msra.gmra.mrb[8].mxu0 %v1521_v17  ;;  %1231 = vmatmul.mubr.bf16.vlgmr.msra.gmra.mrb[8].mxu1 %v1526_v18 }
  0x89   :  { %1235 = vmatpush3.bf16.msra.mxu0 %v1329_v51  ;;  %1255 = vmatpush3.bf16.msra.mxu1 %v1330_v52  ;;  %v1041_v51 = vld [vmem:[%s1631_s5 + $0x3] ss:$0 sm:$0xff] }
  0x8a   :  { %1236 = vmatprep.subr.bf16.mxu0 %v1431_v0  ;;  %1256 = vmatprep.subr.bf16.mxu1 %v1431_v0 }
  0x8b   :  { %1250 = vmatprep.mubr.msk.bf16.mxu0 %vm1432_vm0, %v1431_v0  ;;  %1270 = vmatprep.mubr.msk.bf16.mxu1 %vm1432_vm0, %v1431_v0 }
  0x8d   :  { %1237 = vmatpush3.bf16.msra.mxu0 %v1331_v53  ;;  %1257 = vmatpush3.bf16.msra.mxu1 %v1332_v54 }
  0x8e   :  { %1238 = vmatprep.subr.bf16.mxu0 %v1431_v0  ;;  %1258 = vmatprep.subr.bf16.mxu1 %v1431_v0 }
  0x91   :  { %1239 = vmatpush3.bf16.msra.mxu0 %v1333_v55  ;;  %1259 = vmatpush3.bf16.msra.mxu1 %v1334_v56 }
  0x92   :  { %1240 = vmatprep.subr.bf16.mxu0 %v1431_v0  ;;  %1260 = vmatprep.subr.bf16.mxu1 %v1431_v0 }
  0x95   :  { %1241 = vmatpush3.bf16.msra.mxu0 %v1335_v57  ;;  %1261 = vmatpush3.bf16.msra.mxu1 %v1336_v58 }
  0x96   :  { %1242 = vmatprep.subr.bf16.mxu0 %v1431_v0  ;;  %1262 = vmatprep.subr.bf16.mxu1 %v1431_v0 }
  0x99   :  { %1243 = vmatpush3.bf16.msra.mxu0 %v1337_v59  ;;  %1263 = vmatpush3.bf16.msra.mxu1 %v1338_v60 }
  0x9a   :  { %1244 = vmatprep.subr.bf16.mxu0 %v1431_v0  ;;  %1264 = vmatprep.subr.bf16.mxu1 %v1431_v0 }
  0x9d   :  { %1245 = vmatpush3.bf16.msra.mxu0 %v1339_v61  ;;  %1265 = vmatpush3.bf16.msra.mxu1 %v1340_v62 }
  0x9e   :  { %1246 = vmatprep.subr.bf16.mxu0 %v1431_v0  ;;  %1266 = vmatprep.subr.bf16.mxu1 %v1431_v0 }
  0xa1   :  { %1247 = vmatpush3.bf16.msra.mxu0 %v1341_v63  ;;  %1267 = vmatpush3.bf16.msra.mxu1 %v1342_v1 }
  0xa2   :  { %1248 = vmatprep.subr.bf16.mxu0 %v1431_v0  ;;  %1268 = vmatprep.subr.bf16.mxu1 %v1431_v0 }
  0xa5   :  { %1249 = vmatpush3.bf16.msra.mxu0 %v1343_v2  ;;  %1269 = vmatpush3.bf16.msra.mxu1 %v1344_v3 }
  0xa8   :  { %1251 = vmatmul.mubr.bf16.vlgmr.msra.gmra.mrb[12].mxu0 %v1521_v17  ;;  %1271 = vmatmul.mubr.bf16.vlgmr.msra.gmra.mrb[12].mxu1 %v1526_v18  ;;  %v1005_v18 = vld [vmem:[%s1631_s5 + $0x1] ss:$0 sm:$0xff] }
 0x11b   :  { %v171_v4 = vpop.f32.mrb[0].mxu0  ;;  %v259_v5 = vpop.f32.mrb[0].mxu1 }
 0x11c   :  { %v1132_v6 = vpop.f32.mrb[1].mxu0  ;;  %v260_v7 = vadd.f32 %v259_v5, %v171_v4  ;;  %v1152_v8 = vpop.f32.mrb[1].mxu1 }
 0x11d   :  { %v174_v9 = vpop.f32.mrb[2].mxu0  ;;  %v262_v10 = vpop.f32.mrb[2].mxu1 }
 0x11e   :  { %v1133_v11 = vpop.f32.mrb[3].mxu0  ;;  %v1153_v12 = vpop.f32.mrb[3].mxu1  ;;  %v272_v24 = vadd.f32 %v987_v22, %v260_v7 }
 0x120   :  { %v273_v26 = vmul.f32 0.5, %v272_v24 }
 0x13b   :  { %v393_v13 = vpop.f32.mrb[4].mxu0  ;;  %v481_v14 = vpop.f32.mrb[4].mxu1 }
 0x13c   :  { %v1172_v15 = vpop.f32.mrb[5].mxu0  ;;  %v482_v16 = vadd.f32 %v481_v14, %v393_v13  ;;  %v1192_v0 = vpop.f32.mrb[5].mxu1 }
 0x13d   :  { %v396_v19 = vpop.f32.mrb[6].mxu0  ;;  %v484_v20 = vpop.f32.mrb[6].mxu1 }
 0x13e   :  { %v1173_v21 = vpop.f32.mrb[7].mxu0  ;;  %v1193_v17 = vpop.f32.mrb[7].mxu1  ;;  %v495_v23 = vadd.f32 %v1005_v18, %v482_v16 }
 0x140   :  { %v496_v25 = vmul.f32 0.5, %v495_v23 }
 0x142   :  { %1345 = vtanh.f32 %v496_v25 }
 0x143   :  { %1347 = vtanh.f32 %v273_v26 }
 0x14c   :  { %v1346_v38 = vpop.eup %1345 }
 0x14d   :  { %v1348_v39 = vpop.eup %1347  ;;  %v498_v40 = vadd.f32 1.0, %v1346_v38 }
 0x14e   :  { %v275_v41 = vadd.f32 1.0, %v1348_v39 }
 0x14f   :  { %v499_v42 = vmul.f32 0.5, %v498_v40 }
 0x150   :  { %v276_v44 = vmul.f32 0.5, %v275_v41 }
 0x151   :  { %v944_v46 = vmul.f32 %v943_v43, %v499_v42 }
 0x15b   :  { %v616_v27 = vpop.f32.mrb[8].mxu0  ;;  %v704_v28 = vpop.f32.mrb[8].mxu1 }
 0x15c   :  { %v1212_v30 = vpop.f32.mrb[9].mxu0  ;;  %v705_v31 = vadd.f32 %v704_v28, %v616_v27  ;;  %v1232_v32 = vpop.f32.mrb[9].mxu1 }
 0x15d   :  { %v619_v33 = vpop.f32.mrb[10].mxu0  ;;  %v707_v34 = vpop.f32.mrb[10].mxu1 }
 0x15e   :  { %v1213_v35 = vpop.f32.mrb[11].mxu0  ;;  %v718_v36 = vadd.f32 %v1023_v29, %v705_v31  ;;  %v1233_v37 = vpop.f32.mrb[11].mxu1 }
 0x160   :  { %1349 = vtanh.f32 %v718_v36 }
 0x16a   :  { %v1350_v45 = vpop.eup %1349 }
 0x16b   :  { %v945_v47 = vmul.f32 %v1350_v45, %v276_v44 }
 0x16d   :  { %v946_v48 = vadd.f32 %v945_v47, %v944_v46 }
 0x16f   :  { %950 = vst [vmem:[%s1633_s7] sm:$0xff] %v946_v48  ;;  %s957_s7 = sshll.u32 %s1433_s2, 4  ;;  %s958_s7 = int_to_ptr.vmem [resolvable:$true] %s957_s7 }
 0x170   :  { %s1399_s5 = scalar_lea.vmem %s958_s7, 128  ;;  %p1404_p3 = scmp.lt.s32.totalorder %s958_s7, %s958_s7 }
 0x171   :  { %p1400_p2 = scmp.ne.s32.totalorder %s958_s7, %s1399_s5  ;;  %p1405_p4 = scmp.lt.s32.totalorder %s1399_s5, %s1399_s5 }
 0x173   :  { %p1406_p5 = por %p1405_p4, %p1404_p3 }
 0x175   :  { %p1407_p6 = pnand %p1406_p5, %p1400_p2 }
 0x17b   :  { %v836_v49 = vpop.f32.mrb[12].mxu0  ;;  %v924_v50 = vpop.f32.mrb[12].mxu1 }
 0x17c   :  { %v1252_v52 = vpop.f32.mrb[13].mxu0  ;;  %v925_v53 = vadd.f32 %v924_v50, %v836_v49  ;;  %v1272_v54 = vpop.f32.mrb[13].mxu1 }
 0x17d   :  { %v839_v55 = vpop.f32.mrb[14].mxu0  ;;  %v927_v56 = vpop.f32.mrb[14].mxu1 }
 0x17e   :  { %v1253_v57 = vpop.f32.mrb[15].mxu0  ;;  %v938_v58 = vadd.f32 %v1041_v51, %v925_v53  ;;  %v1273_v59 = vpop.f32.mrb[15].mxu1 }
 0x180   :  { %v939_v60 = vmul.f32 0.5, %v938_v58 }
 0x182   :  { %1351 = vtanh.f32 %v939_v60 }
 0x183   :  { %1353 = vtanh.f32 %v946_v48 }
 0x18c   :  { %v1352_v61 = vpop.eup %1351 }
 0x18d   :  { %v941_v62 = vadd.f32 1.0, %v1352_v61  ;;  %v1354_v1 = vpop.eup %1353 }
 0x18f   :  { %v942_v63 = vmul.f32 0.5, %v941_v62 }
 0x191   :  { %v948_v2 = vmul.f32 %v1354_v1, %v942_v63 }
 0x193   :  { %949 = vst [vmem:[#allocation7] sm:$0xff] %v948_v2 }
 0x194   :  { %1410 = shalt.err (!%p1407_p6)
}
 0x195   :  { %s1411_s18 = scalar_lea.hbm %s1632_s6, 128 }
 0x196   :  { %p1412_p7 = scmp.ne.s32.totalorder %s1632_s6, %s1411_s18  ;;  %p1415_p8 = scmp.lt.u32.totalorder %s1411_s18, %s1632_s6 }
 0x198   :  { %p1417_p9 = pnand %p1415_p8, %p1412_p7 }
 0x19a   :  { %1420 = shalt.err (!%p1417_p9)
}
 0x19b   :  { %960 = dma.vmem_to_hbm [thread:$0]  %s958_s7, 128, %s1632_s6, [#allocation4]  }
 0x19c   :  { %1425 = dma.done.wait [#allocation4], 128  }
 0x19d   :  { %1426 = vsyncadd [#allocation4], 4294967168 }
 0x19e   :  { %968 = vsyncpa [#allocation3], 1 }
 0x19f   :  { %969 = vsyncpa [#allocation6], 1 }
 0x1a0   :  { %970 = vsyncpa [#allocation4], 1 }

</bundles_post_ra>
